<compile_context>
chip_gen: v5e
topology: v5e:2x2
jax: 0.10.0
libtpu: 0.0.40
codegen_flags: <defaults>
</compile_context>

<pallas_src>
import functools

import jax
import jax.numpy as jnp
from jax.experimental import pallas as pl
from jax.experimental.pallas import tpu as pltpu


# ----------------------------------------------------------------------------- 
# VMEM budgets (generation-aware).
# -----------------------------------------------------------------------------
_FALLBACK_VMEM_CAPACITY = 64 * 1024 * 1024  # assume the smallest (v7x) if query fails


def _vmem_capacity_bytes():
    try:
        info = pltpu.get_tpu_info()
        for name in ("vmem_capacity_bytes", "vmem_size_bytes", "vmem_bytes"):
            cap = getattr(info, name, None)
            if cap:
                return int(cap)
    except Exception:
        pass
    return _FALLBACK_VMEM_CAPACITY


def _vmem_limit_bytes():
    # ~70% of physical VMEM as the scoped limit: ~90 MiB on v5e/v6e (128 MiB),
    # ~45 MiB on v7x (64 MiB).  v5e's default scoped limit is only 16 MiB, so
    # always set this explicitly.
    return int(_vmem_capacity_bytes() * 0.70)


def _block_budget_bytes(vmem_limit):
    # Live block buffers + the f32 temps we account for in the tile pickers;
    # keep ~15% headroom under the scoped limit for compiler-internal scratch.
    return int(vmem_limit * 0.85)


def _sublane_multiple(itemsize):
    # Packed-sublane count per dtype: 8 for f32, 16 for bf16/f16, 32 for int8/fp8.
    return max(8, 32 // max(1, itemsize))


def _round_up(x, m):
    return ((x + m - 1) // m) * m


# -----------------------------------------------------------------------------
# Single-pass path: one grid step holds ALL N*H*W elements of a channel tile.
# -----------------------------------------------------------------------------
def _bn_fused_kernel(x_ref, w_ref, b_ref, o_ref, *, eps, inv_count):
    # x_ref: (N, TC, HW) in native dtype; w_ref, b_ref: (TC, 1).
    xf = x_ref[...].astype(jnp.float32)

    # Both moments in one data pass: lane-axis reduce first (XLU), then the
    # small leading-axis reduce.
    s1 = jnp.sum(xf, axis=2, keepdims=True)            # (N, TC, 1)
    s2 = jnp.sum(xf * xf, axis=2, keepdims=True)       # (N, TC, 1)
    mean = jnp.sum(s1, axis=0, keepdims=True) * inv_count   # (1, TC, 1)
    ex2 = jnp.sum(s2, axis=0, keepdims=True) * inv_count    # (1, TC, 1)
    var = jnp.maximum(ex2 - mean * mean, 0.0)           # guard tiny negatives

    inv_std = jax.lax.rsqrt(var + eps)                  # EUP slot, not VALU

    w = w_ref[...].astype(jnp.float32)[None, :, :]      # (1, TC, 1)
    b = b_ref[...].astype(jnp.float32)[None, :, :]
    alpha = inv_std * w
    beta = b - mean * alpha
    # Folded affine: single elementwise pass over the block, no centered copy.
    # Note: padded channels of a partial last block compute garbage stats; the
    # corresponding output rows are discarded on store (benign).
    o_ref[...] = (xf * alpha + beta).astype(o_ref.dtype)


def _pick_channel_tile(n, c, hw, itemsize, block_budget):
    """Channel tile for the single-pass path, or None if it cannot fit VMEM.

    Per-channel footprint: double-buffered input + output blocks plus ~2
    full-block f32 intermediates (the cast input and the pre-cast result).
    """
    per_channel = 4 * n * hw * itemsize + 2 * n * hw * 4
    max_tc = block_budget // per_channel
    m = _sublane_multiple(itemsize)
    if max_tc < min(c, m):
        return None                        # not even a minimal tile fits -> 2-D fallback
    if c <= m:
        return c                           # too few channels to split legally
    max_tc = min(c, (max_tc // m) * m)
    if max_tc < m:
        return None

    candidates = list(range(m, max_tc + 1, m))

    def n_steps(t):
        return -(-c // t)

    # Prefer an even step count (v7x dual-TC) with >= 4 steps (keeps the
    # software pipeline overlapped); within a class, the fewest steps (largest
    # DMAs), then the smallest tile achieving it (least padded tail work).
    for pred in ((lambda t: n_steps(t) % 2 == 0 and n_steps(t) >= 4),
                 (lambda t: n_steps(t) % 2 == 0 and n_steps(t) >= 2),
                 (lambda t: n_steps(t) >= 4),
                 (lambda t: True)):
        sel = [t for t in candidates if pred(t)]
        if sel:
            sel.sort(key=lambda t: (n_steps(t), t))
            return sel[0]
    return m


def _single_pass(x3d, w2d, b2d, eps, n, c, hw, tc, vmem_limit):
    grid = (pl.cdiv(c, tc),)
    return pl.pallas_call(
        functools.partial(_bn_fused_kernel, eps=float(eps),
                          inv_count=1.0 / float(n * hw)),
        out_shape=jax.ShapeDtypeStruct((n, c, hw), x3d.dtype),
        grid_spec=pltpu.PrefetchScalarGridSpec(
            num_scalar_prefetch=0,
            grid=grid,
            in_specs=[
                pl.BlockSpec((n, tc, hw), lambda i: (0, i, 0)),
                pl.BlockSpec((tc, 1), lambda i: (i, 0)),
                pl.BlockSpec((tc, 1), lambda i: (i, 0)),
            ],
            out_specs=pl.BlockSpec((n, tc, hw), lambda i: (0, i, 0)),
        ),
        compiler_params=pltpu.CompilerParams(
            # TODO(synk): on v7x, verify with a trace whether pltpu.CORE_PARALLEL
            # on this axis actually splits grid steps across the two TensorCores;
            # "parallel" is the portable choice across v5e/v6e/v7x.
            dimension_semantics=("parallel",),
            vmem_limit_bytes=vmem_limit,
        ),
    )(x3d, w2d, b2d)


# -----------------------------------------------------------------------------
# Two-pass fallback: 2-D grid (channel tile x HW tile) with sum / sum-sq
# accumulation (reduction axis last), then a normalize pass.
# -----------------------------------------------------------------------------
def _bn_stats_kernel(x_ref, sum_ref, sumsq_ref, *, thw, hw):
    k = pl.program_id(1)

    @pl.when(k == 0)
    def _():
        sum_ref[...] = jnp.zeros_like(sum_ref)
        sumsq_ref[...] = jnp.zeros_like(sumsq_ref)

    xf = x_ref[...].astype(jnp.float32)                 # (N, TC, THW)
    if hw % thw != 0:
        # Mask out-of-range lanes of the (partial) last HW tile so padding
        # garbage does not pollute the channel sums.
        lane = jax.lax.broadcasted_iota(jnp.int32, xf.shape, 2)
        xf = jnp.where(lane < (hw - k * thw), xf, 0.0)

    s1 = jnp.sum(jnp.sum(xf, axis=2), axis=0)           # (TC,)
    s2 = jnp.sum(jnp.sum(xf * xf, axis=2), axis=0)      # (TC,)
    sum_ref[...] += s1[:, None]
    sumsq_ref[...] += s2[:, None]


def _bn_apply_kernel(x_ref, a_ref, b_ref, o_ref):
    xf = x_ref[...].astype(jnp.float32)
    a = a_ref[...][None, :, :]                          # (1, TC, 1)
    b = b_ref[...][None, :, :]
    o_ref[...] = (xf * a + b).astype(o_ref.dtype)


def _pick_two_pass_tiles(n, c, hw, itemsize, block_budget):
    m = _sublane_multiple(itemsize)
    tc = c if c <= m else m
    # Per HW element: double-buffered in/out blocks + ~2 f32 temps.
    per_lane = n * tc * (4 * itemsize + 8)
    max_thw = max(1, block_budget // per_lane)
    if max_thw >= hw:
        thw = hw
    else:
        thw = max(128, (max_thw // 128) * 128)
        thw = min(thw, hw)
    # TODO(synk): for extreme N where even an (n, m, 128) block exceeds VMEM,
    # additionally tile the batch axis with a second accumulator level.
    return tc, thw


def _two_pass(x3d, weight, bias, eps, n, c, hw, tc, thw, vmem_limit):
    count = float(n * hw)
    grid = (pl.cdiv(c, tc), pl.cdiv(hw, thw))

    sums, sumsqs = pl.pallas_call(
        functools.partial(_bn_stats_kernel, thw=thw, hw=hw),
        out_shape=(jax.ShapeDtypeStruct((c, 1), jnp.float32),
                   jax.ShapeDtypeStruct((c, 1), jnp.float32)),
        grid_spec=pltpu.PrefetchScalarGridSpec(
            num_scalar_prefetch=0,
            grid=grid,
            in_specs=[pl.BlockSpec((n, tc, thw), lambda i, k: (0, i, k))],
            out_specs=(pl.BlockSpec((tc, 1), lambda i, k: (i, 0)),
                       pl.BlockSpec((tc, 1), lambda i, k: (i, 0))),
        ),
        compiler_params=pltpu.CompilerParams(
            dimension_semantics=("parallel", "arbitrary"),
            vmem_limit_bytes=vmem_limit,
        ),
    )(x3d)

    wf = weight.astype(jnp.float32)
    bf = bias.astype(jnp.float32)
    mean = sums[:, 0] / count
    var = jnp.maximum(sumsqs[:, 0] / count - mean * mean, 0.0)
    inv_std = jax.lax.rsqrt(var + float(eps))
    alpha = (wf * inv_std).reshape(c, 1)
    beta = (bf - mean * wf * inv_std).reshape(c, 1)

    out3d = pl.pallas_call(
        _bn_apply_kernel,
        out_shape=jax.ShapeDtypeStruct((n, c, hw), x3d.dtype),
        grid_spec=pltpu.PrefetchScalarGridSpec(
            num_scalar_prefetch=0,
            grid=grid,
            in_specs=[
                pl.BlockSpec((n, tc, thw), lambda i, k: (0, i, k)),
                pl.BlockSpec((tc, 1), lambda i, k: (i, 0)),
                pl.BlockSpec((tc, 1), lambda i, k: (i, 0)),
            ],
            out_specs=pl.BlockSpec((n, tc, thw), lambda i, k: (0, i, k)),
        ),
        compiler_params=pltpu.CompilerParams(
            dimension_semantics=("parallel", "parallel"),
            vmem_limit_bytes=vmem_limit,
        ),
    )(x3d, alpha, beta)
    return out3d


# -----------------------------------------------------------------------------
# Public wrapper.
# -----------------------------------------------------------------------------
def trans_layer_rule4(x, weight, bias, eps=1e-5):
    """x: (N, C, H, W); weight, bias: (C,).  Returns normalized (N, C, H, W)."""
    n, c, h, w = x.shape
    hw = h * w

    x3d = x.reshape(n, c, hw)          # free, contiguous reshape (no HBM pass)
    itemsize = jnp.dtype(x.dtype).itemsize

    vmem_limit = _vmem_limit_bytes()
    budget = _block_budget_bytes(vmem_limit)

    tc = _pick_channel_tile(n, c, hw, itemsize, budget)
    if tc is not None:
        out3d = _single_pass(x3d, weight.reshape(c, 1), bias.reshape(c, 1),
                             eps, n, c, hw, tc, vmem_limit)
    else:
        tc2, thw = _pick_two_pass_tiles(n, c, hw, itemsize, budget)
        out3d = _two_pass(x3d, weight, bias, eps, n, c, hw, tc2, thw, vmem_limit)

    return out3d.reshape(n, c, h, w)


def _reference(x, weight, bias, eps=1e-5):
    xf = x.astype(jnp.float32)
    mean = jnp.mean(xf, axis=(0, 2, 3), keepdims=True)
    var = jnp.mean((xf - mean) ** 2, axis=(0, 2, 3), keepdims=True)
    wv = weight.reshape(1, -1, 1, 1)
    bv = bias.reshape(1, -1, 1, 1)
    return ((xf - mean) / jnp.sqrt(var + eps) * wv + bv).astype(x.dtype)


if __name__ == "__main__":
    key = jax.random.PRNGKey(0)
    kx, kw, kb = jax.random.split(key, 3)

    N, C, H, W = 2, 4, 16, 16          # small shape implied by BatchNorm2d usage
    eps = 1e-5

    x = jax.random.normal(kx, (N, C, H, W), dtype=jnp.float32)
    weight = 1.0 + 0.1 * jax.random.normal(kw, (C,), dtype=jnp.float32)
    bias = 0.1 * jax.random.normal(kb, (C,), dtype=jnp.float32)

    out = trans_layer_rule4(x, weight, bias, eps)
    out = jax.block_until_ready(out)
    ref = _reference(x, weight, bias, eps)
    assert out.shape == (N, C, H, W)
    assert jnp.allclose(out, ref, atol=1e-5, rtol=1e-5)

    # Also exercise the large-shape fallback (2-D grid, two-pass) at a small
    # size so that path stays verified on-device.
    out2 = _two_pass(x.reshape(N, C, H * W), weight, bias, eps,
                     N, C, H * W, C, 128, _vmem_limit_bytes())
    out2 = jax.block_until_ready(out2).reshape(N, C, H, W)
    assert jnp.allclose(out2, ref, atol=1e-5, rtol=1e-5)

    print("KERNEL_OK")
</pallas_src>

<mosaic_0001>
module attributes {stable_mosaic.version = 11 : i64} {
  func.func @_bn_fused_kernel(%arg0: i32, %arg1: memref<2x4x256xf32, #tpu.memory_space<vmem>>, %arg2: memref<4x1xf32, #tpu.memory_space<vmem>>, %arg3: memref<4x1xf32, #tpu.memory_space<vmem>>, %arg4: memref<2x4x256xf32, #tpu.memory_space<vmem>>) attributes {dimension_semantics = [#tpu.dimension_semantics<parallel>], iteration_bounds = array<i64: 1>, scalar_prefetch = 0 : i64, scratch_operands = 0 : i64, tpu.core_type = #tpu.core_type<tc>, window_params = [{transform_indices = @transform_0, window_bounds = array<i64: 2, 4, 256>}, {transform_indices = @transform_1, window_bounds = array<i64: 4, 1>}, {transform_indices = @transform_2, window_bounds = array<i64: 4, 1>}, {transform_indices = @transform_3, window_bounds = array<i64: 2, 4, 256>}]} {
    %c0 = arith.constant 0 : index
    %c0_0 = arith.constant 0 : index
    %c0_1 = arith.constant 0 : index
    %0 = vector.load %arg1[%c0, %c0_0, %c0_1] : memref<2x4x256xf32, #tpu.memory_space<vmem>>, vector<2x4x256xf32>
    %cst = arith.constant dense<0.000000e+00> : vector<2x4xf32>
    %1 = vector.multi_reduction <add>, %0, %cst [2] : vector<2x4x256xf32> to vector<2x4xf32>
    %2 = vector.shape_cast %1 : vector<2x4xf32> to vector<2x4x1xf32>
    %3 = arith.mulf %0, %0 : vector<2x4x256xf32>
    %cst_2 = arith.constant dense<0.000000e+00> : vector<2x4xf32>
    %4 = vector.multi_reduction <add>, %3, %cst_2 [2] : vector<2x4x256xf32> to vector<2x4xf32>
    %5 = vector.shape_cast %4 : vector<2x4xf32> to vector<2x4x1xf32>
    %cst_3 = arith.constant dense<0.000000e+00> : vector<4x1xf32>
    %6 = vector.multi_reduction <add>, %2, %cst_3 [0] : vector<2x4x1xf32> to vector<4x1xf32>
    %7 = vector.shape_cast %6 : vector<4x1xf32> to vector<1x4x1xf32>
    %cst_4 = arith.constant 0.001953125 : f32
    %8 = vector.broadcast %cst_4 : f32 to vector<1x4x1xf32>
    %9 = arith.mulf %7, %8 : vector<1x4x1xf32>
    %cst_5 = arith.constant dense<0.000000e+00> : vector<4x1xf32>
    %10 = vector.multi_reduction <add>, %5, %cst_5 [0] : vector<2x4x1xf32> to vector<4x1xf32>
    %11 = vector.shape_cast %10 : vector<4x1xf32> to vector<1x4x1xf32>
    %cst_6 = arith.constant 0.001953125 : f32
    %12 = vector.broadcast %cst_6 : f32 to vector<1x4x1xf32>
    %13 = arith.mulf %11, %12 : vector<1x4x1xf32>
    %14 = arith.mulf %9, %9 : vector<1x4x1xf32>
    %15 = arith.subf %13, %14 : vector<1x4x1xf32>
    %cst_7 = arith.constant 0.000000e+00 : f32
    %16 = vector.broadcast %cst_7 : f32 to vector<1x4x1xf32>
    %17 = arith.maximumf %15, %16 : vector<1x4x1xf32>
    %cst_8 = arith.constant 9.99999974E-6 : f32
    %18 = vector.broadcast %cst_8 : f32 to vector<1x4x1xf32>
    %19 = arith.addf %17, %18 : vector<1x4x1xf32>
    %20 = math.rsqrt %19 : vector<1x4x1xf32>
    %c0_9 = arith.constant 0 : index
    %c0_10 = arith.constant 0 : index
    %21 = vector.load %arg2[%c0_9, %c0_10] : memref<4x1xf32, #tpu.memory_space<vmem>>, vector<4x1xf32>
    %22 = vector.shape_cast %21 : vector<4x1xf32> to vector<1x4x1xf32>
    %c0_11 = arith.constant 0 : index
    %c0_12 = arith.constant 0 : index
    %23 = vector.load %arg3[%c0_11, %c0_12] : memref<4x1xf32, #tpu.memory_space<vmem>>, vector<4x1xf32>
    %24 = vector.shape_cast %23 : vector<4x1xf32> to vector<1x4x1xf32>
    %25 = arith.mulf %20, %22 : vector<1x4x1xf32>
    %26 = arith.mulf %9, %25 : vector<1x4x1xf32>
    %27 = arith.subf %24, %26 : vector<1x4x1xf32>
    %28 = vector.broadcast %25 : vector<1x4x1xf32> to vector<2x4x256xf32>
    %29 = arith.mulf %0, %28 : vector<2x4x256xf32>
    %30 = vector.broadcast %27 : vector<1x4x1xf32> to vector<2x4x256xf32>
    %31 = arith.addf %29, %30 : vector<2x4x256xf32>
    %c0_13 = arith.constant 0 : index
    %c0_14 = arith.constant 0 : index
    %c0_15 = arith.constant 0 : index
    %32 = vector.load %arg4[%c0_13, %c0_14, %c0_15] : memref<2x4x256xf32, #tpu.memory_space<vmem>>, vector<2x4x256xf32>
    tpu.vector_store %arg4[%c0_13, %c0_14, %c0_15], %31 {strides = array<i32>} : memref<2x4x256xf32, #tpu.memory_space<vmem>>, vector<2x4x256xf32>,
    return
  }
  func.func @transform_0(%arg0: i32) -> (i32, i32, i32) {
    %c0_i32 = arith.constant 0 : i32
    %c0_i32_0 = arith.constant 0 : i32
    %c0_i32_1 = arith.constant 0 : i32
    return %c0_i32, %arg0, %c0_i32_0 : i32, i32, i32
  }
  func.func @transform_1(%arg0: i32) -> (i32, i32) {
    %c0_i32 = arith.constant 0 : i32
    %c0_i32_0 = arith.constant 0 : i32
    return %arg0, %c0_i32 : i32, i32
  }
  func.func @transform_2(%arg0: i32) -> (i32, i32) {
    %c0_i32 = arith.constant 0 : i32
    %c0_i32_0 = arith.constant 0 : i32
    return %arg0, %c0_i32 : i32, i32
  }
  func.func @transform_3(%arg0: i32) -> (i32, i32, i32) {
    %c0_i32 = arith.constant 0 : i32
    %c0_i32_0 = arith.constant 0 : i32
    %c0_i32_1 = arith.constant 0 : i32
    return %c0_i32, %arg0, %c0_i32_0 : i32, i32, i32
  }
}

</mosaic_0001>

<bundles_post_ra>
// kernel: tpu_custom_call.1
= control target key start
LH: loop header
LB: loop body
LE: loop exit
PB: predicated region body
PF: predicated region fallthrough
CT: control target
= control target key end

     0   :  { %8 = vsyncpa [#allocation3], 0  ;;  %s282_s0 = inlined_call_operand.hbm [shape: f32[2,4,256], index: 0, kind: input, shape index: {}]   ;;  %s283_s1 = inlined_call_operand.vmem [shape: f32[4,1], index: 1, kind: input, shape index: {}]   ;;  %s284_s2 = inlined_call_operand.vmem [shape: f32[4,1], index: 2, kind: input, shape index: {}]   ;;  %s285_s3 = inlined_call_operand.hbm [shape: f32[2,4,256], index: 3, kind: output, shape index: {}]  }
   0x1   :  { %9 = vsyncpa [#allocation4], 0  ;;  %s14_s14 = sshll.u32 %s282_s0, 4  ;;  %s214_s15 = smov [#allocation2]   ;;  %s15_s14 = int_to_ptr.hbm [resolvable:$true] %s14_s14 }
   0x2   :  { %s16_s16 = sshll.u32 %s214_s15, 4  ;;  %s215_s17 = smov 128   ;;  %s17_s16 = int_to_ptr.vmem [resolvable:$true] %s16_s16 }
   0x3   :  { %s216_s18 = smov 8  }
   0x4   :  { %22 = dma.hbm_to_vmem [thread:$0]  %s15_s14, 256, %s17_s16, [#allocation3], %s215_s17, %s215_s17, %s216_s18  }
   0x5   :  { %210 = dma.done.wait [#allocation3], 256  }
   0x6   :  { %211 = vsyncadd [#allocation3], 4294967040  ;;  %v246_v0 = vld [vmem:[#allocation2] sm:$0xff]  ;;  %v248_v1 = vld [vmem:[#allocation2 + $0x8] sm:$0xff]  ;;  %vm46_vm0 = vcmask 1043456   ;;  %v217_v25 = vmov 0  }
   0x7   :  { %35 = vst [vmem:[#allocation1] ss:$2 sm:$0xff] %v246_v0  ;;  %v57_v2 = vmul.f32 %v246_v0, %v246_v0  ;;  %v58_v3 = vmul.f32 %v248_v1, %v248_v1  ;;  %158 = vset.pattern.permute.xlu2 %v217_v25  ;;  %159 = vset.pattern.permute.xlu0 %v217_v25  ;;  %v104_v47 = vld [vmem:[%s283_s1] sm:$0xf]  ;;  %v218_v53 = vmov 839922192  }
   0x8   :  { %39 = vst [vmem:[#allocation1 + $0x10] ss:$2 sm:$0xff] %v248_v1  ;;  %v105_v51 = vld [vmem:[%s284_s2] sm:$0xf]  ;;  %v114_v54 = vunpack.c.l.s4 %v218_v53  ;;  %s219_s1 = smov [#allocation5]   ;;  %s139_s25 = sshll.u32 %s285_s3, 4  ;;  %s140_s25 = int_to_ptr.hbm [resolvable:$true] %s139_s25 }
   0x9   :  { %s137_s22 = sshll.u32 %s219_s1, 4  ;;  %s138_s22 = int_to_ptr.vmem [resolvable:$true] %s137_s22 }
   0xa   :  { %v115_v56 = vunpack.c.0.s8 %v114_v54 }
   0xe   :  { %v36_v4 = vld.sshfl [vmem:[#allocation1] sm:$0xff pattern:$0x75316420]  ;;  %v37_v5 = vld.sshfl [vmem:[#allocation1 + $0x8] sm:$0xff pattern:$0x75316420] }
   0xf   :  { %v47_v6 = vsel %vm46_vm0, %v36_v4, 0.0  ;;  %v48_v7 = vsel %vm46_vm0, %v37_v5, 0.0  ;;  %61 = vst [vmem:[#allocation1] ss:$2 sm:$0xff] %v57_v2 }
  0x10   :  { %v49_v8 = vadd.f32 %v48_v7, %v47_v6  ;;  %v40_v9 = vld.sshfl [vmem:[#allocation1 + $0x10] sm:$0xff pattern:$0x75316420]  ;;  %v41_v10 = vld.sshfl [vmem:[#allocation1 + $0x18] sm:$0xff pattern:$0x75316420] }
  0x11   :  { %65 = vst [vmem:[#allocation1 + $0x10] ss:$2 sm:$0xff] %v58_v3  ;;  %v52_v11 = vsel %vm46_vm0, %v40_v9, 0.0  ;;  %v53_v12 = vsel %vm46_vm0, %v41_v10, 0.0 }
  0x12   :  { %50 = vadd.xlane.f32.xlu0 %v49_v8  ;;  %v54_v15 = vadd.f32 %v53_v12, %v52_v11 }
  0x16   :  { %v62_v13 = vld.sshfl [vmem:[#allocation1] sm:$0xff pattern:$0x75316420]  ;;  %v63_v14 = vld.sshfl [vmem:[#allocation1 + $0x8] sm:$0xff pattern:$0x75316420] }
  0x17   :  { %v72_v16 = vsel %vm46_vm0, %v62_v13, 0.0  ;;  %v73_v17 = vsel %vm46_vm0, %v63_v14, 0.0 }
  0x18   :  { %v74_v18 = vadd.f32 %v73_v17, %v72_v16  ;;  %v66_v19 = vld.sshfl [vmem:[#allocation1 + $0x10] sm:$0xff pattern:$0x75316420]  ;;  %v67_v20 = vld.sshfl [vmem:[#allocation1 + $0x18] sm:$0xff pattern:$0x75316420] }
  0x19   :  { %v77_v21 = vsel %vm46_vm0, %v66_v19, 0.0  ;;  %v78_v22 = vsel %vm46_vm0, %v67_v20, 0.0 }
  0x1a   :  { %75 = vadd.xlane.f32.xlu1 %v74_v18  ;;  %55 = vadd.xlane.f32.xlu0 %v54_v15  ;;  %v79_v23 = vadd.f32 %v78_v22, %v77_v21 }
  0x22   :  { %80 = vadd.xlane.f32.xlu1 %v79_v23 }
  0x85   :  { %v51_v24 = vpop.xlane.xlu0 %50 }
  0x86   :  { %v82_v29 = vsel %vm46_vm0, %v51_v24, 0.0 }
  0x8d   :  { %v76_v26 = vpop.xlane.xlu1 %75  ;;  %v56_v27 = vpop.xlane.xlu0 %55 }
  0x8e   :  { %v83_v28 = vsel %vm46_vm0, %v56_v27, 0.0  ;;  %v86_v33 = vsel %vm46_vm0, %v76_v26, 0.0 }
  0x8f   :  { %v84_v30 = vadd.f32 %v83_v28, %v82_v29 }
  0x91   :  { %v85_v31 = vmul.f32 0.001953125, %v84_v30 }
  0x93   :  { %v90_v36 = vmul.f32 %v85_v31, %v85_v31 }
  0x95   :  { %v81_v32 = vpop.xlane.xlu1 %80 }
  0x96   :  { %v87_v34 = vsel %vm46_vm0, %v81_v32, 0.0 }
  0x97   :  { %v88_v35 = vadd.f32 %v87_v34, %v86_v33 }
  0x99   :  { %v89_v37 = vmul.f32 0.001953125, %v88_v35 }
  0x9b   :  { %v91_v38 = vsub.f32 %v89_v37, %v90_v36 }
  0x9d   :  { %v92_v39 = vmax.f32 %v91_v38, 0.0 }
  0x9f   :  { %v93_v40 = vadd.f32 1e-05, %v92_v39 }
  0xa1   :  { %160 = vrsqrt.f32 %v93_v40  ;;  %vm100_vm2 = vweird.f32 %v93_v40 }
  0xa7   :  { %v161_v41 = vpop.eup %160 }
  0xa8   :  { %v95_v42 = vmul.f32 %v161_v41, %v93_v40  ;;  %vm101_vm1 = vweird.f32 %v161_v41 }
  0xa9   :  { %vm102_vm3 = vmor %vm100_vm2, %vm101_vm1 }
  0xaa   :  { %v96_v43 = vmul.f32 %v161_v41, %v95_v42 }
  0xac   :  { %v97_v44 = vmul.f32 0.5, %v96_v43 }
  0xae   :  { %v98_v45 = vsub.f32 1.5, %v97_v44 }
  0xb0   :  { %v99_v46 = vmul.f32 %v161_v41, %v98_v45 }
  0xb2   :  { %v103_v48 = vsel %vm102_vm3, %v161_v41, %v99_v46 }
  0xb3   :  { %v106_v49 = vmul.f32 %v104_v47, %v103_v48 }
  0xb5   :  { %111 = vperm.xlu2 %158, %v106_v49   ;;  %v107_v50 = vmul.f32 %v106_v49, %v85_v31 }
  0xb7   :  { %v108_v52 = vsub.f32 %v105_v51, %v107_v50 }
  0xbd   :  { %122 = vperm.xlu2 %158, %v108_v52  }
 0x10f   :  { %v112_v55 = vpop.permute.xlu2 %111 }
 0x110   :  { %v116_v57 = vperm.slane %v112_v55, %v115_v56 }
 0x112   :  { %v118_v59 = vmul.f32 %v116_v57, %v246_v0  ;;  %v119_v60 = vmul.f32 %v116_v57, %v248_v1 }
 0x117   :  { %v123_v58 = vpop.permute.xlu2 %122 }
 0x118   :  { %v127_v61 = vperm.slane %v123_v58, %v115_v56 }
 0x11a   :  { %v129_v62 = vadd.f32 %v127_v61, %v118_v59  ;;  %v130_v63 = vadd.f32 %v127_v61, %v119_v60 }
 0x11c   :  { %131 = vst [vmem:[#allocation5] sm:$0xff] %v129_v62 }
 0x11d   :  { %132 = vst [vmem:[#allocation5 + $0x8] sm:$0xff] %v130_v63 }
 0x11e   :  { %145 = dma.vmem_to_hbm [thread:$0]  %s138_s22, 256, %s140_s25, [#allocation4], %s215_s17, %s215_s17, %s216_s18  }
 0x11f   :  { %212 = dma.done.wait [#allocation4], 256  }
 0x120   :  { %213 = vsyncadd [#allocation4], 4294967040 }
 0x121   :  { %150 = vsyncpa [#allocation3], 1 }
 0x122   :  { %151 = vsyncpa [#allocation4], 1 }

</bundles_post_ra>
